<compile_context>
chip_gen: v6e
topology: v6e:2x2x1
jax: 0.10.0
libtpu: 0.0.40
codegen_flags: <defaults>
</compile_context>

<pallas_src>
import jax
import jax.numpy as jnp
from jax.experimental import pallas as pl
from jax.experimental.pallas import tpu as pltpu

# ----- model hyper-parameters (small, consistent with the module) -----------
BATCH = 8
INPUT_SIZE = 16
LATENT_SIZE = 4
CATEGORICAL_SIZE = 4
GROUP_SIZE = 2
ENCODE_HIDDEN = (32, 32)
H0, H1 = ENCODE_HIDDEN
RH0, RH1 = tuple(reversed(ENCODE_HIDDEN))
LATCAT = LATENT_SIZE * CATEGORICAL_SIZE        # 16
LANES = 128                                    # lane-dense padding width
OUT_LO, OUT_HI = LATCAT, LATCAT + INPUT_SIZE   # decoder-output lanes in slab

# data-slab lane layout: one (B, 128) row holds x | gumbel | s | zero pad
X_LO, X_HI = 0, INPUT_SIZE                     # [0, 16)
G_LO, G_HI = X_HI, X_HI + LATCAT               # [16, 32)
S_LO, S_HI = G_HI, G_HI + GROUP_SIZE           # [32, 34)

# ----- packed parameter slab layout: name -> (row0, col0, rows, cols) -------
# Narrow entries share 8-row-aligned bands in separate lane groups so the
# single slab is only 112 rows (56 KB) instead of one 128-wide band per entry.
# All row starts are multiples of 8; lane offsets are sub-tile (handled by
# Mosaic relayout rotates on the otherwise idle XLU).
_LAYOUT = {
    # band A: rows [0, 16)
    "e_w1":     (0,   0,  INPUT_SIZE, H0),       # encoder fc1 weight
    "d_w1z":    (0,  32,  LATCAT,     RH0),      # decoder fc1 (z part)
    "gsum":     (0,  64,  LATCAT,     LATCAT),   # block-diag ones (group sum)
    "e_shiftf": (0,  80,  1,          LATCAT),   # enc BN fold: b3*scale+shift
    "d_w1s":    (0,  96,  GROUP_SIZE, RH0),      # decoder fc1 (s part)
    # band B: rows [16, 48)
    "e_w2":     (16,  0,  H0,         H1),
    "d_w2":     (16, 32,  RH0,        RH1),
    "e_w3f":    (16, 64,  H1,         LATCAT),   # enc fc3 weight * BN scale
    # band C: row 48 (biases side-by-side in lane groups)
    "e_b1":     (48,  0,  1,          H0),
    "e_b2":     (48, 32,  1,          H1),
    "d_b1":     (48, 64,  1,          RH0),
    "d_b2":     (48, 96,  1,          RH1),
    # band D: row 56 (full-width folded decoder shift, output lanes [16,32))
    "d_shiftf": (56,  0,  1,          LANES),
    # band E: rows [64, 96) — folded decoder last-layer weight, zero-padded so
    # the matmul lands the decoder output in lanes [16,32) of the slab
    "d_w3f":    (64,  0,  RH1,        LANES),
    # band F: rows [96, 112) — identity placing z into lanes [0,16)
    "p_z":      (96,  0,  LATCAT,     LANES),
}
PARAM_ROWS = 112                               # multiple of 8; 112*128*4 = 56 KB


def _vfae_kernel(inv_temp_ref, data_ref, p_ref, out_ref):
    f32 = jnp.float32

    def P(name):
        r0, c0, rows, cols = _LAYOUT[name]
        return p_ref[r0:r0 + rows, c0:c0 + cols]   # static slice of VMEM slab

    # single full-tile load of the packed per-call data, then lane slices
    d = data_ref[...]
    x = d[:, X_LO:X_HI]
    g = d[:, G_LO:G_HI]
    s = d[:, S_LO:S_HI]

    # ---------------- encoder NeuralNetwork (fc->ReLU x2, fc + BN folded) ----
    h = jnp.maximum(jnp.dot(x, P("e_w1"), preferred_element_type=f32) + P("e_b1"), 0.0)
    h = jnp.maximum(jnp.dot(h, P("e_w2"), preferred_element_type=f32) + P("e_b2"), 0.0)
    q = jnp.dot(h, P("e_w3f"), preferred_element_type=f32) + P("e_shiftf")

    # ---------------- gumbel-softmax (hard=False) -----------------------------
    # Whole-row max subtraction is exact for the grouped softmax (per-row
    # constant); the block-diagonal-ones matmul broadcasts each categorical
    # group's denominator to its 4 lanes without slices/concats.
    y = (q + g) * inv_temp_ref[0]
    y = y - jnp.max(y, axis=-1, keepdims=True)
    e = jnp.exp(y)
    denom = jnp.dot(e, P("gsum"), preferred_element_type=f32)
    z = e / denom                                              # (B, LATCAT)

    # ---------------- decoder NeuralNetwork -----------------------------------
    # decoder input = concat([z, s], dim=1) realized as a split matmul.
    h = jnp.maximum(jnp.dot(z, P("d_w1z"), preferred_element_type=f32)
                    + jnp.dot(s, P("d_w1s"), preferred_element_type=f32)
                    + P("d_b1"), 0.0)
    h = jnp.maximum(jnp.dot(h, P("d_w2"), preferred_element_type=f32) + P("d_b2"), 0.0)

    # ---------------- lane-dense output slab ----------------------------------
    # z -> lanes [0,16) via a placement identity, decoder output -> lanes
    # [16,32) via the zero-padded folded last-layer weights: one unmasked
    # 128-lane store / one writeback DMA.
    slab = (jnp.dot(z, P("p_z"), preferred_element_type=f32)
            + jnp.dot(h, P("d_w3f"), preferred_element_type=f32)
            + P("d_shiftf"))
    out_ref[...] = slab.astype(out_ref.dtype)


# ---------------------------- init / packing --------------------------------
def _linear_init(key, fan_in, fan_out):
    """PyTorch-style default Linear init (uniform +/- 1/sqrt(fan_in))."""
    kw, kb = jax.random.split(key)
    bound = 1.0 / jnp.sqrt(jnp.asarray(fan_in, jnp.float32))
    w = jax.random.uniform(kw, (fan_in, fan_out), jnp.float32, -bound, bound)
    b = jax.random.uniform(kb, (1, fan_out), jnp.float32, -bound, bound)
    return w, b


def _bn_params(key, n, eps=1e-5):
    """Deterministic BatchNorm1d eval-mode params folded to scale/shift."""
    k1, k2, k3, k4 = jax.random.split(key, 4)
    gamma = 1.0 + 0.1 * jax.random.normal(k1, (1, n), jnp.float32)
    beta = 0.1 * jax.random.normal(k2, (1, n), jnp.float32)
    running_mean = 0.1 * jax.random.normal(k3, (1, n), jnp.float32)
    running_var = 1.0 + 0.1 * jax.random.uniform(k4, (1, n), jnp.float32)
    scale = gamma / jnp.sqrt(running_var + eps)
    shift = beta - running_mean * scale
    return scale, shift


def init_params(key):
    ks = jax.random.split(key, 8)
    e_w1, e_b1 = _linear_init(ks[0], INPUT_SIZE, H0)
    e_w2, e_b2 = _linear_init(ks[1], H0, H1)
    e_w3, e_b3 = _linear_init(ks[2], H1, LATCAT)
    e_scale, e_shift = _bn_params(ks[3], LATCAT)
    d_w1, d_b1 = _linear_init(ks[4], LATCAT + GROUP_SIZE, RH0)
    d_w2, d_b2 = _linear_init(ks[5], RH0, RH1)
    d_w3, d_b3 = _linear_init(ks[6], RH1, INPUT_SIZE)
    d_scale, d_shift = _bn_params(ks[7], INPUT_SIZE)
    return dict(e_w1=e_w1, e_b1=e_b1, e_w2=e_w2, e_b2=e_b2, e_w3=e_w3, e_b3=e_b3,
                e_scale=e_scale, e_shift=e_shift,
                d_w1z=d_w1[:LATCAT], d_w1s=d_w1[LATCAT:], d_b1=d_b1,
                d_w2=d_w2, d_b2=d_b2, d_w3=d_w3, d_b3=d_b3,
                d_scale=d_scale, d_shift=d_shift)


def pack_params(p):
    """Fold BN affines into last-layer weights and pack everything into one
    lane-densified (PARAM_ROWS, 128) f32 slab => a single 56 KB HBM->VMEM DMA."""
    e_w3f = p["e_w3"] * p["e_scale"]
    e_shiftf = p["e_b3"] * p["e_scale"] + p["e_shift"]
    d_w3f_core = p["d_w3"] * p["d_scale"]
    d_shiftf_core = p["d_b3"] * p["d_scale"] + p["d_shift"]

    d_w3f = jnp.zeros((RH1, LANES), jnp.float32).at[:, OUT_LO:OUT_HI].set(d_w3f_core)
    d_shiftf = jnp.zeros((1, LANES), jnp.float32).at[:, OUT_LO:OUT_HI].set(d_shiftf_core)
    p_z = jnp.zeros((LATCAT, LANES), jnp.float32).at[:, :LATCAT].set(
        jnp.eye(LATCAT, dtype=jnp.float32))
    grp = jnp.arange(LATCAT) // CATEGORICAL_SIZE
    gsum = (grp[:, None] == grp[None, :]).astype(jnp.float32)

    entries = dict(
        e_w1=p["e_w1"], e_b1=p["e_b1"], e_w2=p["e_w2"], e_b2=p["e_b2"],
        e_w3f=e_w3f, e_shiftf=e_shiftf,
        d_w1z=p["d_w1z"], d_w1s=p["d_w1s"], d_b1=p["d_b1"],
        d_w2=p["d_w2"], d_b2=p["d_b2"],
        d_w3f=d_w3f, d_shiftf=d_shiftf, p_z=p_z, gsum=gsum)

    packed = jnp.zeros((PARAM_ROWS, LANES), jnp.float32)
    for name, (r0, c0, rows, cols) in _LAYOUT.items():
        arr = entries[name].astype(jnp.float32).reshape(rows, cols)
        packed = packed.at[r0:r0 + rows, c0:c0 + cols].set(arr)
    return packed


# ---------------------------- wrapper ----------------------------------------
@jax.jit
def bernoulli_vfae_forward(x, s, gumbel_noise, temp, packed_params):
    """Returns the lane-dense (B, 128) output slab:
       z = slab[:, 0:16), decoder output = slab[:, 16:32)."""
    b = x.shape[0]
    inv_temp = jnp.reshape(1.0 / temp, (1,)).astype(jnp.float32)   # 1-D SMEM scalar

    # One lane-packed (B, 128) data row per sample: x | gumbel | s | zeros.
    data = jnp.concatenate(
        [x.astype(jnp.float32),
         gumbel_noise.astype(jnp.float32),
         s.astype(jnp.float32),
         jnp.zeros((b, LANES - S_HI), jnp.float32)], axis=1)

    slab = pl.pallas_call(
        _vfae_kernel,
        out_shape=jax.ShapeDtypeStruct((b, LANES), jnp.float32),
        # Whole arrays resident in VMEM; no grid needed at this size.
        in_specs=[
            pl.BlockSpec(memory_space=pltpu.MemorySpace.SMEM),   # (1,) 1/temp
            pl.BlockSpec(memory_space=pltpu.MemorySpace.VMEM),   # data slab
            pl.BlockSpec(memory_space=pltpu.MemorySpace.VMEM),   # param slab
        ],
        out_specs=pl.BlockSpec(memory_space=pltpu.MemorySpace.VMEM),
    )(inv_temp, data, packed_params)
    return slab


def split_slab(slab):
    """Convenience view for consumers that need (z, out) separately."""
    return slab[:, :LATCAT], slab[:, OUT_LO:OUT_HI]


# ---------------------------- pure-JAX reference -----------------------------
def _reference_forward(x, s, gumbel_noise, temp, p):
    """Mirrors the PyTorch forward (eval mode, hard=False), unfolded BN."""
    h = jnp.maximum(x @ p["e_w1"] + p["e_b1"], 0.0)
    h = jnp.maximum(h @ p["e_w2"] + p["e_b2"], 0.0)
    q = (h @ p["e_w3"] + p["e_b3"]) * p["e_scale"] + p["e_shift"]
    q_y = q.reshape(BATCH, LATENT_SIZE, CATEGORICAL_SIZE)
    g = gumbel_noise.reshape(BATCH, LATENT_SIZE, CATEGORICAL_SIZE)
    z = jax.nn.softmax((q_y + g) / temp, axis=-1).reshape(BATCH, LATCAT)
    h = jnp.maximum(z @ p["d_w1z"] + s @ p["d_w1s"] + p["d_b1"], 0.0)
    h = jnp.maximum(h @ p["d_w2"] + p["d_b2"], 0.0)
    o = (h @ p["d_w3"] + p["d_b3"]) * p["d_scale"] + p["d_shift"]
    return z, o


if __name__ == "__main__":
    key = jax.random.PRNGKey(0)
    k_x, k_s, k_u, k_p = jax.random.split(key, 4)

    x = jax.random.normal(k_x, (BATCH, INPUT_SIZE), jnp.float32)
    s_idx = jax.random.randint(k_s, (BATCH,), 0, GROUP_SIZE)
    s = jax.nn.one_hot(s_idx, GROUP_SIZE, dtype=jnp.float32)
    temp = jnp.float32(0.5)

    # sample_gumbel: -log(-log(U + eps) + eps)  (sampled in glue, not in-kernel)
    eps = 1e-20
    u = jax.random.uniform(k_u, (BATCH, LATCAT), jnp.float32)
    gumbel_noise = -jnp.log(-jnp.log(u + eps) + eps)

    raw_params = init_params(k_p)
    packed_params = pack_params(raw_params)

    slab = bernoulli_vfae_forward(x, s, gumbel_noise, temp, packed_params)
    jax.block_until_ready(slab)

    # Validation only: slicing the slab happens outside the hot path.
    z, out = split_slab(slab)
    z_ref, out_ref = _reference_forward(x, s, gumbel_noise, temp, raw_params)
    # Tolerance 1e-4: kernel folds BN into weights and stabilizes the grouped
    # softmax with the row max (mathematically exact; fp-reassociated).
    assert jnp.allclose(z, z_ref, atol=1e-4, rtol=1e-4)
    assert jnp.allclose(out, out_ref, atol=1e-4, rtol=1e-4)
    assert z.shape == (BATCH, LATCAT) and out.shape == (BATCH, INPUT_SIZE)

    print("KERNEL_OK")
</pallas_src>

<mosaic_0001>
module attributes {stable_mosaic.version = 11 : i64} {
  func.func @_vfae_kernel(%arg0: memref<1xf32, #tpu.memory_space<smem>>, %arg1: memref<8x128xf32, #tpu.memory_space<vmem>>, %arg2: memref<112x128xf32, #tpu.memory_space<vmem>>, %arg3: memref<8x128xf32, #tpu.memory_space<vmem>>) attributes {dimension_semantics = [], scalar_prefetch = 0 : i64, scratch_operands = 0 : i64, tpu.core_type = #tpu.core_type<tc>} {
    %c0 = arith.constant 0 : index
    %c0_0 = arith.constant 0 : index
    %0 = vector.load %arg1[%c0, %c0_0] : memref<8x128xf32, #tpu.memory_space<vmem>>, vector<8x128xf32>
    %1 = vector.extract_strided_slice %0 {offsets = [0, 0], sizes = [8, 16], strides = [1, 1]} : vector<8x128xf32> to vector<8x16xf32>
    %2 = vector.extract_strided_slice %0 {offsets = [0, 16], sizes = [8, 16], strides = [1, 1]} : vector<8x128xf32> to vector<8x16xf32>
    %3 = vector.extract_strided_slice %0 {offsets = [0, 32], sizes = [8, 2], strides = [1, 1]} : vector<8x128xf32> to vector<8x2xf32>
    %c0_1 = arith.constant 0 : index
    %c0_2 = arith.constant 0 : index
    %4 = vector.load %arg2[%c0_1, %c0_2] : memref<112x128xf32, #tpu.memory_space<vmem>>, vector<16x32xf32>
    %cst = arith.constant dense<0.000000e+00> : vector<8x32xf32>
    %5 = tpu.matmul %1, %4, %cst {dimension_numbers = #tpu.dot_dimension_numbers<[1], [0], [0], [1], [0, 0, 1, 1], [], []>} : vector<8x16xf32>, vector<16x32xf32>, vector<8x32xf32> -> vector<8x32xf32>
    %c48 = arith.constant 48 : index
    %c0_3 = arith.constant 0 : index
    %6 = vector.load %arg2[%c48, %c0_3] : memref<112x128xf32, #tpu.memory_space<vmem>>, vector<1x32xf32>
    %7 = vector.broadcast %6 : vector<1x32xf32> to vector<8x32xf32>
    %8 = arith.addf %5, %7 : vector<8x32xf32>
    %cst_4 = arith.constant 0.000000e+00 : f32
    %9 = vector.broadcast %cst_4 : f32 to vector<8x32xf32>
    %10 = arith.maximumf %8, %9 : vector<8x32xf32>
    %c16 = arith.constant 16 : index
    %c0_5 = arith.constant 0 : index
    %11 = vector.load %arg2[%c16, %c0_5] : memref<112x128xf32, #tpu.memory_space<vmem>>, vector<32x32xf32>
    %cst_6 = arith.constant dense<0.000000e+00> : vector<8x32xf32>
    %12 = tpu.matmul %10, %11, %cst_6 {dimension_numbers = #tpu.dot_dimension_numbers<[1], [0], [0], [1], [0, 0, 1, 1], [], []>} : vector<8x32xf32>, vector<32x32xf32>, vector<8x32xf32> -> vector<8x32xf32>
    %c48_7 = arith.constant 48 : index
    %c32 = arith.constant 32 : index
    %13 = vector.load %arg2[%c48_7, %c32] : memref<112x128xf32, #tpu.memory_space<vmem>>, vector<1x32xf32>
    %14 = vector.broadcast %13 : vector<1x32xf32> to vector<8x32xf32>
    %15 = arith.addf %12, %14 : vector<8x32xf32>
    %cst_8 = arith.constant 0.000000e+00 : f32
    %16 = vector.broadcast %cst_8 : f32 to vector<8x32xf32>
    %17 = arith.maximumf %15, %16 : vector<8x32xf32>
    %c16_9 = arith.constant 16 : index
    %c64 = arith.constant 64 : index
    %18 = vector.load %arg2[%c16_9, %c64] : memref<112x128xf32, #tpu.memory_space<vmem>>, vector<32x16xf32>
    %cst_10 = arith.constant dense<0.000000e+00> : vector<8x16xf32>
    %19 = tpu.matmul %17, %18, %cst_10 {dimension_numbers = #tpu.dot_dimension_numbers<[1], [0], [0], [1], [0, 0, 1, 1], [], []>} : vector<8x32xf32>, vector<32x16xf32>, vector<8x16xf32> -> vector<8x16xf32>
    %c0_11 = arith.constant 0 : index
    %c80 = arith.constant 80 : index
    %20 = vector.load %arg2[%c0_11, %c80] : memref<112x128xf32, #tpu.memory_space<vmem>>, vector<1x16xf32>
    %21 = vector.broadcast %20 : vector<1x16xf32> to vector<8x16xf32>
    %22 = arith.addf %19, %21 : vector<8x16xf32>
    %23 = arith.addf %22, %2 : vector<8x16xf32>
    %c0_12 = arith.constant 0 : index
    %24 = memref.load %arg0[%c0_12] : memref<1xf32, #tpu.memory_space<smem>>
    %25 = vector.broadcast %24 : f32 to vector<8x16xf32>
    %26 = arith.mulf %23, %25 : vector<8x16xf32>
    %cst_13 = arith.constant dense<0xFF800000> : vector<8xf32>
    %27 = vector.multi_reduction <maximumf>, %26, %cst_13 [1] : vector<8x16xf32> to vector<8xf32>
    %28 = vector.shape_cast %27 : vector<8xf32> to vector<8x1xf32>
    %29 = vector.broadcast %28 : vector<8x1xf32> to vector<8x16xf32>
    %30 = arith.subf %26, %29 : vector<8x16xf32>
    %31 = math.exp %30 : vector<8x16xf32>
    %c0_14 = arith.constant 0 : index
    %c64_15 = arith.constant 64 : index
    %32 = vector.load %arg2[%c0_14, %c64_15] : memref<112x128xf32, #tpu.memory_space<vmem>>, vector<16x16xf32>
    %cst_16 = arith.constant dense<0.000000e+00> : vector<8x16xf32>
    %33 = tpu.matmul %31, %32, %cst_16 {dimension_numbers = #tpu.dot_dimension_numbers<[1], [0], [0], [1], [0, 0, 1, 1], [], []>} : vector<8x16xf32>, vector<16x16xf32>, vector<8x16xf32> -> vector<8x16xf32>
    %34 = arith.divf %31, %33 : vector<8x16xf32>
    %c0_17 = arith.constant 0 : index
    %c32_18 = arith.constant 32 : index
    %35 = vector.load %arg2[%c0_17, %c32_18] : memref<112x128xf32, #tpu.memory_space<vmem>>, vector<16x32xf32>
    %cst_19 = arith.constant dense<0.000000e+00> : vector<8x32xf32>
    %36 = tpu.matmul %34, %35, %cst_19 {dimension_numbers = #tpu.dot_dimension_numbers<[1], [0], [0], [1], [0, 0, 1, 1], [], []>} : vector<8x16xf32>, vector<16x32xf32>, vector<8x32xf32> -> vector<8x32xf32>
    %c0_20 = arith.constant 0 : index
    %c96 = arith.constant 96 : index
    %37 = vector.load %arg2[%c0_20, %c96] : memref<112x128xf32, #tpu.memory_space<vmem>>, vector<2x32xf32>
    %cst_21 = arith.constant dense<0.000000e+00> : vector<8x32xf32>
    %38 = tpu.matmul %3, %37, %cst_21 {dimension_numbers = #tpu.dot_dimension_numbers<[1], [0], [0], [1], [0, 0, 1, 1], [], []>} : vector<8x2xf32>, vector<2x32xf32>, vector<8x32xf32> -> vector<8x32xf32>
    %39 = arith.addf %36, %38 : vector<8x32xf32>
    %c48_22 = arith.constant 48 : index
    %c64_23 = arith.constant 64 : index
    %40 = vector.load %arg2[%c48_22, %c64_23] : memref<112x128xf32, #tpu.memory_space<vmem>>, vector<1x32xf32>
    %41 = vector.broadcast %40 : vector<1x32xf32> to vector<8x32xf32>
    %42 = arith.addf %39, %41 : vector<8x32xf32>
    %cst_24 = arith.constant 0.000000e+00 : f32
    %43 = vector.broadcast %cst_24 : f32 to vector<8x32xf32>
    %44 = arith.maximumf %42, %43 : vector<8x32xf32>
    %c16_25 = arith.constant 16 : index
    %c32_26 = arith.constant 32 : index
    %45 = vector.load %arg2[%c16_25, %c32_26] : memref<112x128xf32, #tpu.memory_space<vmem>>, vector<32x32xf32>
    %cst_27 = arith.constant dense<0.000000e+00> : vector<8x32xf32>
    %46 = tpu.matmul %44, %45, %cst_27 {dimension_numbers = #tpu.dot_dimension_numbers<[1], [0], [0], [1], [0, 0, 1, 1], [], []>} : vector<8x32xf32>, vector<32x32xf32>, vector<8x32xf32> -> vector<8x32xf32>
    %c48_28 = arith.constant 48 : index
    %c96_29 = arith.constant 96 : index
    %47 = vector.load %arg2[%c48_28, %c96_29] : memref<112x128xf32, #tpu.memory_space<vmem>>, vector<1x32xf32>
    %48 = vector.broadcast %47 : vector<1x32xf32> to vector<8x32xf32>
    %49 = arith.addf %46, %48 : vector<8x32xf32>
    %cst_30 = arith.constant 0.000000e+00 : f32
    %50 = vector.broadcast %cst_30 : f32 to vector<8x32xf32>
    %51 = arith.maximumf %49, %50 : vector<8x32xf32>
    %c96_31 = arith.constant 96 : index
    %c0_32 = arith.constant 0 : index
    %52 = vector.load %arg2[%c96_31, %c0_32] : memref<112x128xf32, #tpu.memory_space<vmem>>, vector<16x128xf32>
    %cst_33 = arith.constant dense<0.000000e+00> : vector<8x128xf32>
    %53 = tpu.matmul %34, %52, %cst_33 {dimension_numbers = #tpu.dot_dimension_numbers<[1], [0], [0], [1], [0, 0, 1, 1], [], []>} : vector<8x16xf32>, vector<16x128xf32>, vector<8x128xf32> -> vector<8x128xf32>
    %c64_34 = arith.constant 64 : index
    %c0_35 = arith.constant 0 : index
    %54 = vector.load %arg2[%c64_34, %c0_35] : memref<112x128xf32, #tpu.memory_space<vmem>>, vector<32x128xf32>
    %cst_36 = arith.constant dense<0.000000e+00> : vector<8x128xf32>
    %55 = tpu.matmul %51, %54, %cst_36 {dimension_numbers = #tpu.dot_dimension_numbers<[1], [0], [0], [1], [0, 0, 1, 1], [], []>} : vector<8x32xf32>, vector<32x128xf32>, vector<8x128xf32> -> vector<8x128xf32>
    %56 = arith.addf %53, %55 : vector<8x128xf32>
    %c56 = arith.constant 56 : index
    %c0_37 = arith.constant 0 : index
    %57 = vector.load %arg2[%c56, %c0_37] : memref<112x128xf32, #tpu.memory_space<vmem>>, vector<1x128xf32>
    %58 = vector.broadcast %57 : vector<1x128xf32> to vector<8x128xf32>
    %59 = arith.addf %56, %58 : vector<8x128xf32>
    %c0_38 = arith.constant 0 : index
    %c0_39 = arith.constant 0 : index
    %60 = vector.load %arg3[%c0_38, %c0_39] : memref<8x128xf32, #tpu.memory_space<vmem>>, vector<8x128xf32>
    tpu.vector_store %arg3[%c0_38, %c0_39], %59 {strides = array<i32>} : memref<8x128xf32, #tpu.memory_space<vmem>>, vector<8x128xf32>,
    return
  }
}

</mosaic_0001>

<bundles_post_ra>
// kernel: bernoulli_vfae_forward.1
= control target key start
LH: loop header
LB: loop body
LE: loop exit
PB: predicated region body
PF: predicated region fallthrough
CT: control target
= control target key end

     0   :  { %9 = vsyncpa [#allocation4], 0  ;;  %s1140_s0 = inlined_call_operand.<no memory space> [shape: f32[1], index: 0, kind: input, shape index: {}]   ;;  %s1141_s1 = inlined_call_operand.vmem [shape: f32[8,128], index: 1, kind: input, shape index: {}]   ;;  %s1142_s2 = inlined_call_operand.hbm [shape: f32[112,128], index: 2, kind: input, shape index: {}]   ;;  %s1143_s3 = inlined_call_operand.hbm [shape: f32[8,128], index: 3, kind: output, shape index: {}]  }
   0x1   :  { %10 = vsyncpa [#allocation5], 0  ;;  %s999_s12 = smov [#allocation3]  }
   0x2   :  { %s20_s13 = sshll.u32 %s999_s12, 4  ;;  %s21_s13 = int_to_ptr.vmem [resolvable:$true] %s20_s13 }
   0x3   :  { %s963_s14 = scalar_lea.vmem %s21_s13, 1792  ;;  %p968_p1 = scmp.lt.s32.totalorder %s21_s13, %s21_s13 }
   0x4   :  { %p964_p0 = scmp.ne.s32.totalorder %s21_s13, %s963_s14  ;;  %p969_p2 = scmp.lt.s32.totalorder %s963_s14, %s963_s14 }
   0x6   :  { %p970_p3 = por %p969_p2, %p968_p1 }
   0x8   :  { %p971_p4 = pnand %p970_p3, %p964_p0 }
   0xa   :  { %974 = shalt.err (!%p971_p4)
}
   0xb   :  { %s1000_s15 = smov 128   ;;  %s1001_s16 = smov 8  }
   0xc   :  { %26 = dma.hbm_to_vmem [thread:$0]  %s1142_s2, 1792, %s21_s13, [#allocation4], %s1000_s15, %s1000_s15, %s1001_s16  }
   0xd   :  { %995 = dma.done.wait [#allocation4], 1792  }
   0xe   :  { %996 = vsyncadd [#allocation4], 4294965504  ;;  %v1002_v0 = vmov 0.0   ;;  %vm1003_vm0 = vmmov 0   ;;  %v32_v1 = vld [vmem:[#allocation3 + $0x8] sm:$0xff]  ;;  %v1039_v2 = vld [vmem:[#allocation3] sm:$0xff]  ;;  %v299_v28 = vstv %s1140_s0 }
   0xf   :  { %863 = vmatprep.subr.mxu0 %v1002_v0  ;;  %867 = vmatprep.mubr.msk.f32.mxu0 %vm1003_vm0, %v1002_v0  ;;  %v1044_v3 = vld [vmem:[%s1141_s1] sm:$0xff]  ;;  %vm38_vm1 = vcmask 130048   ;;  %v1046_v4 = vld [vmem:[#allocation3 + $0x28] sm:$0xff]  ;;  %v114_v6 = vld [vmem:[#allocation3 + $0x18] sm:$0xff]  ;;  %s1004_s1 = smov 64   ;;  %s1005_s20 = smov 96  }
  0x10   :  { %870 = vmatprep.subr.mxu1 %v1002_v0  ;;  %878 = vmatprep.mubr.msk.f32.mxu1 %vm1003_vm0, %v1002_v0  ;;  %v1057_v5 = vld [vmem:[#allocation3 + $0x20] sm:$0xff]  ;;  %v1062_v7 = vld [vmem:[#allocation3 + $0x10] sm:$0xff]  ;;  %vm121_vm2 = vcmask 261120   ;;  %s1006_s21 = smov 48   ;;  %s1007_s22 = smov 112   ;;  %vm399_vm3 = vcmask 1041408  }
  0x11   :  { %864 = vmatpush3.msra.mxu0 %v32_v1  ;;  %871 = vmatpush3.msra.mxu1 %v1046_v4  ;;  %v1065_v8 = vld [vmem:[#allocation3 + $0x30] ss:$0 sm:$0xff]  ;;  %v819_v18 = vld [vmem:[#allocation3] ss:$0 sm:$0xff]  ;;  %s1008_s25 = smov 32   ;;  %vm396_vm4 = vcmask 15360  }
  0x12   :  { %865 = vmatprep.subr.mxu0 %v1002_v0  ;;  %872 = vmatprep.subr.mxu1 %v1002_v0  ;;  %v390_v34 = vld [vmem:[#allocation3] sm:$0x3]  ;;  %v650_v54 = vld [vmem:[#allocation3 + $0x58] sm:$0xff]  ;;  %v646_v60 = vld [vmem:[#allocation3 + $0x68] sm:$0xff]  ;;  %s1009_s0 = smov [#allocation6]  }
  0x13   :  { %866 = vmatpush3.msra.mxu0 %v1039_v2  ;;  %873 = vmatpush3.msra.mxu1 %v1057_v5  ;;  %v645_v61 = vld [vmem:[#allocation3 + $0x60] sm:$0xff]  ;;  %v649_v62 = vld [vmem:[#allocation3 + $0x50] sm:$0xff]  ;;  %v648_v63 = vld [vmem:[#allocation3 + $0x48] sm:$0xff]  ;;  %s807_s26 = sshll.u32 %s1009_s0, 4  ;;  %s808_s26 = int_to_ptr.vmem [resolvable:$true] %s807_s26 }
  0x14   :  { %868 = vmatmul.mubr.msk.f32.vlgmr.msra.gmra.mxu0 %vm38_vm1, %v1044_v3  ;;  %881 = vmatprep.subr.mxu0 %v1002_v0  ;;  %s975_s27 = scalar_lea.vmem %s808_s26, 128  ;;  %p980_p6 = scmp.lt.s32.totalorder %s808_s26, %s808_s26 }
  0x15   :  { %889 = vmatprep.mubr.msk.f32.mxu0 %vm1003_vm0, %v1002_v0  ;;  %874 = vmatprep.subr.mxu1 %v1002_v0  ;;  %p976_p5 = scmp.ne.s32.totalorder %s808_s26, %s975_s27  ;;  %p981_p7 = scmp.lt.s32.totalorder %s975_s27, %s975_s27 }
  0x16   :  { %875 = vmatpush3.msra.mxu1 %v114_v6  ;;  %211 = vrot.lane.b32.xlu0 %v1046_v4, %s1004_s1 }
  0x17   :  { %876 = vmatprep.subr.mxu1 %v1002_v0  ;;  %118 = vrot.lane.b32.xlu1 %v1065_v8, %s1005_s20  ;;  %p982_p8 = por %p981_p7, %p980_p6 }
  0x18   :  { %877 = vmatpush3.msra.mxu1 %v1062_v7 }
  0x19   :  { %892 = vmatprep.subr.mxu1 %v1002_v0  ;;  %p983_p9 = pnand %p982_p8, %p976_p5 }
  0x1a   :  { %209 = vrot.lane.b32.xlu0 %v1057_v5, %s1004_s1 }
  0x1b   :  { %207 = vrot.lane.b32.xlu1 %v114_v6, %s1004_s1 }
  0x1e   :  { %205 = vrot.lane.b32.xlu0 %v1062_v7, %s1004_s1 }
  0x1f   :  { %218 = vrot.lane.b32.xlu1 %v819_v18, %s1006_s21 }
  0x22   :  { %294 = vrot.lane.b32.xlu0 %v1044_v3, %s1007_s22 }
  0x26   :  { %311 = vrot.lane.b32.xlu0 %v32_v1, %s1004_s1 }
  0x2a   :  { %309 = vrot.lane.b32.xlu0 %v1039_v2, %s1004_s1 }
  0x2e   :  { %474 = vrot.lane.b32.xlu0 %v32_v1, %s1005_s20  ;;  %v647_v1 = vld [vmem:[#allocation3 + $0x40] sm:$0xff] }
  0x32   :  { %394 = vrot.lane.b32.xlu0 %v390_v34, %s1008_s25 }
  0x36   :  { %472 = vrot.lane.b32.xlu0 %v1039_v2, %s1005_s20 }
  0x3a   :  { %391 = vrot.lane.b32.xlu0 %v1044_v3, %s1005_s20 }
  0x3e   :  { %562 = vrot.lane.b32.xlu0 %v1046_v4, %s1005_s20 }
  0x42   :  { %560 = vrot.lane.b32.xlu0 %v1057_v5, %s1005_s20 }
  0x46   :  { %551 = vrot.lane.b32.xlu0 %v1065_v8, %s1004_s1 }
  0x4a   :  { %556 = vrot.lane.b32.xlu0 %v1062_v7, %s1005_s20 }
  0x4e   :  { %568 = vrot.lane.b32.xlu0 %v1065_v8, %s1008_s25 }
  0x88   :  { %v212_v9 = vpop.permute.xlu0 %211 }
  0x89   :  { %882 = vmatpush3.msra.mxu0 %v212_v9  ;;  %v119_v15 = vpop.permute.xlu1 %118 }
  0x8a   :  { %883 = vmatprep.subr.mxu0 %v1002_v0 }
  0x8c   :  { %v210_v10 = vpop.permute.xlu0 %209 }
  0x8d   :  { %884 = vmatpush3.msra.mxu0 %v210_v10  ;;  %v208_v16 = vpop.permute.xlu1 %207  ;;  %v828_v10 = vld [vmem:[#allocation3 + $0x38] ss:$0 sm:$0xff] }
  0x8e   :  { %885 = vmatprep.subr.mxu0 %v1002_v0 }
  0x8f   :  { %886 = vmatpush3.msra.mxu0 %v208_v16 }
  0x90   :  { %v206_v17 = vpop.permute.xlu0 %205  ;;  %887 = vmatprep.subr.mxu0 %v1002_v0 }
  0x91   :  { %888 = vmatpush3.msra.mxu0 %v206_v17  ;;  %v219_v23 = vpop.permute.xlu1 %218 }
  0x92   :  { %899 = vmatprep.subr.mxu0 %v1002_v0 }
  0x94   :  { %v295_v25 = vpop.permute.xlu0 %294 }
  0x98   :  { %v312_v32 = vpop.permute.xlu0 %311 }
  0x9c   :  { %v310_v33 = vpop.permute.xlu0 %309 }
  0xa0   :  { %v475_v39 = vpop.permute.xlu0 %474 }
  0xa4   :  { %v395_v40 = vpop.permute.xlu0 %394 }
  0xa8   :  { %v473_v41 = vpop.permute.xlu0 %472 }
  0xac   :  { %v392_v42 = vpop.permute.xlu0 %391 }
  0xb0   :  { %v563_v43 = vpop.permute.xlu0 %562 }
  0xb4   :  { %v561_v44 = vpop.permute.xlu0 %560 }
  0xb8   :  { %v552_v51 = vpop.permute.xlu0 %551 }
  0xbc   :  { %v557_v53 = vpop.permute.xlu0 %556 }
  0xc0   :  { %v569_v2 = vpop.permute.xlu0 %568 }
  0xd4   :  { %v108_v11 = vpop.f32.mrf.mxu0 }
  0xd5   :  { %v109_v12 = vadd.f32 %v1065_v8, %v108_v11 }
  0xd6   :  { %v869_v13 = vpop.f32.mrf.mxu0 }
  0xd7   :  { %v112_v14 = vmax.f32 %v109_v12, 0.0 }
  0xd9   :  { %879 = vmatmul.mubr.msk.f32.vlgmr.msra.gmra.mxu1 %vm121_vm2, %v112_v14 }
  0xda   :  { %896 = vmatprep.mubr.msk.f32.mxu1 %vm1003_vm0, %v1002_v0  ;;  %893 = vmatpush3.msra.mxu1 %v312_v32 }
  0xdb   :  { %894 = vmatprep.subr.mxu1 %v1002_v0 }
  0xdc   :  { %895 = vmatpush3.msra.mxu1 %v310_v33 }
  0xdd   :  { %904 = vmatprep.subr.mxu1 %v1002_v0 }
 0x199   :  { %v191_v19 = vpop.f32.mrf.mxu1 }
 0x19a   :  { %v192_v20 = vadd.f32 %v191_v19, %v119_v15 }
 0x19b   :  { %v880_v21 = vpop.f32.mrf.mxu1 }
 0x19c   :  { %v195_v22 = vmax.f32 %v192_v20, 0.0 }
 0x19e   :  { %890 = vmatmul.mubr.msk.f32.vlgmr.msra.gmra.mxu0 %vm121_vm2, %v195_v22 }
 0x19f   :  { %901 = vmatprep.mubr.msk.f32.mxu0 %vm1003_vm0, %v1002_v0  ;;  %900 = vmatpush3.msk.msra.mxu0 %vm399_vm3, %v395_v40 }
 0x1a0   :  { %911 = vmatprep.subr.mxu0 %v1002_v0 }
 0x1a2   :  { %902 = vmatmul.mubr.msk.f32.vlgmr.msra.gmra.mxu0 %vm396_vm4, %v392_v42 }
 0x1a3   :  { %919 = vmatprep.mubr.msk.f32.mxu0 %vm1003_vm0, %v1002_v0  ;;  %912 = vmatpush3.msra.mxu0 %v563_v43 }
 0x1a4   :  { %913 = vmatprep.subr.mxu0 %v1002_v0 }
 0x1a5   :  { %914 = vmatpush3.msra.mxu0 %v561_v44 }
 0x1a6   :  { %915 = vmatprep.subr.mxu0 %v1002_v0 }
 0x25e   :  { %v290_v24 = vpop.f32.mrf.mxu0 }
 0x25f   :  { %v291_v26 = vadd.f32 %v290_v24, %v219_v23 }
 0x260   :  { %v891_v27 = vpop.f32.mrf.mxu0 }
 0x261   :  { %v297_v29 = vadd.f32 %v295_v25, %v291_v26 }
 0x262   :  { %v468_v49 = vpop.f32.mrf.mxu0 }
 0x263   :  { %v300_v30 = vmul.f32 %v299_v28, %v297_v29 }
 0x264   :  { %v903_v50 = vpop.f32.mrf.mxu0 }
 0x265   :  { %v301_v31 = vsel %vm38_vm1, %v300_v30, -inf }
 0x266   :  { %302 = vmax.xlane.f32.xlu1 %v301_v31 }
 0x277   :  { %558 = vrot.lane.b32.xlu1 %v114_v6, %s1005_s20 }
 0x2ef   :  { %v303_v35 = vpop.xlane.xlu1 %302 }
 0x2f0   :  { %v304_v36 = vsub.f32 %v300_v30, %v303_v35 }
 0x2f2   :  { %v305_v37 = vmul.f32 1.442695, %v304_v36 }
 0x2f3   :  { %v559_v52 = vpop.permute.xlu1 %558 }
 0x2f4   :  { %951 = vpow2.f32 %v305_v37  ;;  %916 = vmatpush3.msra.mxu0 %v559_v52 }
 0x2f5   :  { %917 = vmatprep.subr.mxu0 %v1002_v0 }
 0x2f6   :  { %918 = vmatpush3.msra.mxu0 %v557_v53 }
 0x2f7   :  { %933 = vmatprep.subr.mxu0 %v1002_v0 }
 0x301   :  { %v952_v38 = vpop.eup %951 }
 0x302   :  { %897 = vmatmul.mubr.msk.f32.vlgmr.msra.gmra.mxu1 %vm38_vm1, %v952_v38 }
 0x303   :  { %908 = vmatprep.mubr.msk.f32.mxu1 %vm1003_vm0, %v1002_v0  ;;  %905 = vmatpush3.msra.mxu1 %v475_v39 }
 0x304   :  { %906 = vmatprep.subr.mxu1 %v1002_v0 }
 0x305   :  { %907 = vmatpush3.msra.mxu1 %v473_v41 }
 0x306   :  { %922 = vmatprep.subr.mxu1 %v1002_v0 }
 0x3c2   :  { %v384_v45 = vpop.f32.mrf.mxu1 }
 0x3c3   :  { %953 = vrcp.f32 %v384_v45 }
 0x3c4   :  { %v898_v46 = vpop.f32.mrf.mxu1 }
 0x3d0   :  { %v954_v47 = vpop.eup %953 }
 0x3d1   :  { %v389_v48 = vmul.f32 %v954_v47, %v952_v38 }
 0x3d3   :  { %909 = vmatmul.mubr.msk.f32.vlgmr.msra.gmra.mxu1 %vm38_vm1, %v389_v48 }
 0x3d4   :  { %930 = vmatprep.mubr.msk.f32.mxu1 %vm1003_vm0, %v1002_v0  ;;  %923 = vmatpush3.msra.mxu1 %v650_v54 }
 0x3d5   :  { %924 = vmatprep.subr.mxu1 %v1002_v0 }
 0x3d6   :  { %925 = vmatpush3.msra.mxu1 %v649_v62 }
 0x3d7   :  { %926 = vmatprep.subr.mxu1 %v1002_v0 }
 0x3d8   :  { %927 = vmatpush3.msra.mxu1 %v648_v63 }
 0x3d9   :  { %928 = vmatprep.subr.mxu1 %v1002_v0 }
 0x3da   :  { %929 = vmatpush3.msra.mxu1 %v647_v1 }
 0x493   :  { %v547_v55 = vpop.f32.mrf.mxu1 }
 0x494   :  { %v548_v56 = vadd.f32 %v547_v55, %v468_v49 }
 0x495   :  { %v910_v57 = vpop.f32.mrf.mxu1 }
 0x496   :  { %v554_v58 = vadd.f32 %v552_v51, %v548_v56 }
 0x498   :  { %v555_v59 = vmax.f32 %v554_v58, 0.0 }
 0x49a   :  { %920 = vmatmul.mubr.msk.f32.vlgmr.msra.gmra.mxu0 %vm121_vm2, %v555_v59 }
 0x49b   :  { %934 = vmatpush3.msra.mxu0 %v646_v60  ;;  %937 = vmatprep.mubr.msk.f32.mxu0 %vm1003_vm0, %v1002_v0 }
 0x49c   :  { %935 = vmatprep.subr.mxu0 %v1002_v0 }
 0x49d   :  { %936 = vmatpush3.msra.mxu0 %v645_v61 }
 0x49e   :  { %938 = vmatmul.mubr.msk.f32.vlgmr.msra.gmra.mxu0 %vm38_vm1, %v389_v48 }
 0x55a   :  { %v640_v3 = vpop.f32.mrf.mxu0 }
 0x55b   :  { %v641_v4 = vadd.f32 %v640_v3, %v569_v2 }
 0x55c   :  { %v921_v5 = vpop.f32.mrf.mxu0 }
 0x55d   :  { %v644_v6 = vmax.f32 %v641_v4, 0.0 }
 0x55e   :  { %v790_v7 = vpop.f32.mrf.mxu0 }
 0x55f   :  { %931 = vmatmul.mubr.msk.f32.vlgmr.msra.gmra.mxu1 %vm121_vm2, %v644_v6 }
 0x560   :  { %v939_v8 = vpop.f32.mrf.mxu0 }
 0x61f   :  { %v720_v9 = vpop.f32.mrf.mxu1 }
 0x620   :  { %v791_v11 = vadd.f32 %v790_v7, %v720_v9 }
 0x621   :  { %v932_v12 = vpop.f32.mrf.mxu1 }
 0x622   :  { %v799_v13 = vadd.f32 %v828_v10, %v791_v11 }
 0x624   :  { %800 = vst [vmem:[#allocation6] sm:$0xff] %v799_v13 }
 0x625   :  { %986 = shalt.err (!%p983_p9)
}
 0x626   :  { %810 = dma.vmem_to_hbm [thread:$0]  %s808_s26, 128, %s1143_s3, [#allocation5]  }
 0x627   :  { %997 = dma.done.wait [#allocation5], 128  }
 0x628   :  { %998 = vsyncadd [#allocation5], 4294967168 }
 0x629   :  { %814 = vsyncpa [#allocation4], 1 }
 0x62a   :  { %815 = vsyncpa [#allocation5], 1 }

</bundles_post_ra>
